<compile_context>
chip_gen: v7x
topology: tpu7x:2x2x1
jax: 0.10.0
libtpu: 0.0.40
codegen_flags: <defaults>
</compile_context>

<pallas_src>
import functools

import jax
import jax.numpy as jnp
from jax.experimental import pallas as pl
from jax.experimental.pallas import tpu as pltpu


def _round_up(x, m):
    return ((x + m - 1) // m) * m


# ----------------------------------------------------------------------------
# Pallas kernel: (split-concat) Linear+ReLU -> Linear+ReLU -> fused [mean|std] head
# ----------------------------------------------------------------------------
def _emission_kernel(nr_inputs,
                     phi_ref, h_ref, act_ref,        # row tiles of the three inputs
                     w0p_ref, w0h_ref, w0a_ref, b0_ref,   # linear_obs_decoder (row-split w0)
                     w1_ref, b1_ref,                 # dec
                     wh_ref, bh_ref,                 # fused head [dec_mean | dec_std]
                     out_ref):
    # linear_obs_decoder: concat folded into three partial matmuls, + bias, ReLU
    h0 = (jnp.dot(phi_ref[...], w0p_ref[...], preferred_element_type=jnp.float32)
          + jnp.dot(h_ref[...],  w0h_ref[...], preferred_element_type=jnp.float32)
          + jnp.dot(act_ref[...], w0a_ref[...], preferred_element_type=jnp.float32)
          + b0_ref[...])
    h0 = jnp.maximum(h0, 0.0)

    # dec: Linear + ReLU
    h1 = jnp.dot(h0, w1_ref[...], preferred_element_type=jnp.float32) + b1_ref[...]
    h1 = jnp.maximum(h1, 0.0)

    # fused head: one lane-dense MXU push producing [mean | std_pre_softplus | pad]
    head = jnp.dot(h1, wh_ref[...], preferred_element_type=jnp.float32) + bh_ref[...]

    # Softplus (PyTorch semantics: x if x > 20 else log1p(exp(x))) applied only to the std
    # columns via a full-lane select; padded columns are sliced off in the wrapper.
    sp = jnp.where(head > 20.0, head, jnp.log1p(jnp.exp(jnp.minimum(head, 20.0))))
    col = jax.lax.broadcasted_iota(jnp.int32, head.shape, dimension=1)
    out_ref[...] = jnp.where(col >= nr_inputs, sp, head).astype(out_ref.dtype)


# ----------------------------------------------------------------------------
# Wrapper: parameter packing (pad to 128 lanes, fuse heads), row tiling, pallas_call
# ----------------------------------------------------------------------------
@jax.jit
def vrnn_emission_forward(phi_z, h, encoded_action, params):
    """phi_z, h: [B, P, h_dim]; encoded_action: [B, P, action_encoding].

    Returns (dec_mean_t, dec_std_t), each of shape [B, P, nr_inputs]."""
    B, P, pz_dim = phi_z.shape
    ph_dim = h.shape[-1]
    A = encoded_action.shape[-1]
    N = B * P

    w0, b0 = params["w0"], params["b0"]
    w1, b1 = params["w1"], params["b1"]
    wm, bm = params["wm"], params["bm"]
    ws, bs = params["ws"], params["bs"]

    cnn = w0.shape[1]
    hid = w1.shape[1]
    nr_inputs = wm.shape[1]

    CNN_P = _round_up(cnn, 128)
    HID_P = _round_up(hid, 128)
    OUT = 2 * nr_inputs
    OUT_P = _round_up(OUT, 128)

    # ---- pack / pad parameters (tiny: ~tens of KB; padded columns contribute zeros) ----
    w0p = jnp.pad(w0[:pz_dim], ((0, 0), (0, CNN_P - cnn)))
    w0h = jnp.pad(w0[pz_dim:pz_dim + ph_dim], ((0, 0), (0, CNN_P - cnn)))
    w0a = jnp.pad(w0[pz_dim + ph_dim:], ((0, 0), (0, CNN_P - cnn)))
    b0p = jnp.pad(b0, ((0, 0), (0, CNN_P - cnn)))
    w1p = jnp.pad(w1, ((0, CNN_P - cnn), (0, HID_P - hid)))
    b1p = jnp.pad(b1, ((0, 0), (0, HID_P - hid)))
    whp = jnp.pad(jnp.concatenate([wm, ws], axis=1), ((0, HID_P - hid), (0, OUT_P - OUT)))
    bhp = jnp.pad(jnp.concatenate([bm, bs], axis=1), ((0, 0), (0, OUT_P - OUT)))

    # ---- flatten particles into rows and pad rows to the tile size ----
    TM = min(512, _round_up(N, 8))          # large tile for pipelining; fits default VMEM budget
    N_pad = _round_up(N, TM)

    def flat(x):
        x = x.reshape(N, x.shape[-1])
        if N_pad != N:
            x = jnp.pad(x, ((0, N_pad - N), (0, 0)))
        return x

    phi_f, h_f, act_f = flat(phi_z), flat(h), flat(encoded_action)

    enc_dim = pz_dim + ph_dim + A
    flops = 2 * N_pad * (enc_dim * CNN_P + CNN_P * HID_P + HID_P * OUT_P)
    bytes_accessed = 4 * (N_pad * (enc_dim + OUT_P)
                          + w0p.size + w0h.size + w0a.size + b0p.size
                          + w1p.size + b1p.size + whp.size + bhp.size)
    cost = pl.CostEstimate(flops=flops,
                           transcendentals=2 * N_pad * OUT_P,
                           bytes_accessed=bytes_accessed)

    def row_spec(d):
        return pl.BlockSpec((TM, d), lambda i: (i, 0))

    def const_spec(a):
        return pl.BlockSpec(a.shape, lambda i: (0, 0))

    packed = pl.pallas_call(
        functools.partial(_emission_kernel, nr_inputs),
        out_shape=jax.ShapeDtypeStruct((N_pad, OUT_P), jnp.float32),
        grid_spec=pltpu.PrefetchScalarGridSpec(
            num_scalar_prefetch=0,
            grid=(N_pad // TM,),
            in_specs=[row_spec(pz_dim), row_spec(ph_dim), row_spec(A),
                      const_spec(w0p), const_spec(w0h), const_spec(w0a), const_spec(b0p),
                      const_spec(w1p), const_spec(b1p),
                      const_spec(whp), const_spec(bhp)],
            out_specs=pl.BlockSpec((TM, OUT_P), lambda i: (i, 0)),
        ),
        compiler_params=pltpu.CompilerParams(
            # row axis is fully independent -> shard across TensorCores on v7x
            dimension_semantics=("parallel",),
            # per-step VMEM (~1.5 MiB at TM=512) is far below every chip's scoped default,
            # so no vmem_limit_bytes override is needed even on v5e / v7x.
        ),
        cost_estimate=cost,
    )(phi_f, h_f, act_f, w0p, w0h, w0a, b0p, w1p, b1p, whp, bhp)

    dec_mean_t = packed[:N, :nr_inputs].reshape(B, P, nr_inputs)
    dec_std_t = packed[:N, nr_inputs:OUT].reshape(B, P, nr_inputs)
    return dec_mean_t, dec_std_t


# ----------------------------------------------------------------------------
# Deterministic parameter init (PyTorch nn.Linear default: U(-1/sqrt(fan_in), +1/sqrt(fan_in)))
# ----------------------------------------------------------------------------
def init_params(key, h_dim, action_encoding, cnn_output_number, nr_inputs):
    def linear(key, fan_in, fan_out):
        kw, kb = jax.random.split(key)
        bound = 1.0 / jnp.sqrt(fan_in)
        w = jax.random.uniform(kw, (fan_in, fan_out), jnp.float32, -bound, bound)
        b = jax.random.uniform(kb, (1, fan_out), jnp.float32, -bound, bound)
        return w, b

    enc_dim = h_dim + h_dim + action_encoding
    k0, k1, k2, k3 = jax.random.split(key, 4)
    w0, b0 = linear(k0, enc_dim, cnn_output_number)        # linear_obs_decoder
    w1, b1 = linear(k1, cnn_output_number, h_dim)           # dec
    wm, bm = linear(k2, h_dim, nr_inputs)                   # dec_mean
    ws, bs = linear(k3, h_dim, nr_inputs)                   # dec_std (pre-Softplus)
    return dict(w0=w0, b0=b0, w1=w1, b1=b1, wm=wm, bm=bm, ws=ws, bs=bs)


# ----------------------------------------------------------------------------
# Pure-JAX reference for a sanity check
# ----------------------------------------------------------------------------
def reference_forward(phi_z, h, encoded_action, params):
    B, P, _ = phi_z.shape
    x = jnp.concatenate([phi_z, h, encoded_action], axis=2).reshape(B * P, -1)
    h0 = jax.nn.relu(x @ params["w0"] + params["b0"])
    h1 = jax.nn.relu(h0 @ params["w1"] + params["b1"])
    mean = h1 @ params["wm"] + params["bm"]
    s_lin = h1 @ params["ws"] + params["bs"]
    std = jnp.where(s_lin > 20.0, s_lin, jnp.log1p(jnp.exp(jnp.minimum(s_lin, 20.0))))
    obs_dim = mean.shape[-1]
    return mean.reshape(B, P, obs_dim), std.reshape(B, P, obs_dim)


if __name__ == "__main__":
    # Small shapes consistent with the module's forward.
    batch_size = 2
    num_particles = 4
    h_dim = 32
    action_encoding = 16
    cnn_channels = 64          # -> cnn_output_number for 'fc'
    nr_inputs = 32             # observation feature dim for 'fc'

    key = jax.random.PRNGKey(0)
    kp, k1, k2, k3 = jax.random.split(key, 4)

    params = init_params(kp, h_dim, action_encoding, cnn_channels, nr_inputs)

    phi_z = jax.random.normal(k1, (batch_size, num_particles, h_dim), jnp.float32)
    h_prev = jax.random.normal(k2, (batch_size, num_particles, h_dim), jnp.float32)
    encoded_action = jax.random.normal(
        k3, (batch_size, num_particles, action_encoding), jnp.float32)

    dec_mean_t, dec_std_t = vrnn_emission_forward(phi_z, h_prev, encoded_action, params)
    jax.block_until_ready((dec_mean_t, dec_std_t))

    ref_mean, ref_std = reference_forward(phi_z, h_prev, encoded_action, params)
    assert dec_mean_t.shape == (batch_size, num_particles, nr_inputs)
    assert dec_std_t.shape == (batch_size, num_particles, nr_inputs)
    assert jnp.allclose(dec_mean_t, ref_mean, atol=1e-5, rtol=1e-5)
    assert jnp.allclose(dec_std_t, ref_std, atol=1e-5, rtol=1e-5)

    print("KERNEL_OK")
</pallas_src>

<mosaic_0001>
module attributes {stable_mosaic.version = 11 : i64} {
  func.func @_emission_kernel(%arg0: i32, %arg1: memref<8x32xf32, #tpu.memory_space<vmem>>, %arg2: memref<8x32xf32, #tpu.memory_space<vmem>>, %arg3: memref<8x16xf32, #tpu.memory_space<vmem>>, %arg4: memref<32x128xf32, #tpu.memory_space<vmem>>, %arg5: memref<32x128xf32, #tpu.memory_space<vmem>>, %arg6: memref<16x128xf32, #tpu.memory_space<vmem>>, %arg7: memref<1x128xf32, #tpu.memory_space<vmem>>, %arg8: memref<128x128xf32, #tpu.memory_space<vmem>>, %arg9: memref<1x128xf32, #tpu.memory_space<vmem>>, %arg10: memref<128x128xf32, #tpu.memory_space<vmem>>, %arg11: memref<1x128xf32, #tpu.memory_space<vmem>>, %arg12: memref<8x128xf32, #tpu.memory_space<vmem>>) attributes {dimension_semantics = [#tpu.dimension_semantics<parallel>], iteration_bounds = array<i64: 1>, scalar_prefetch = 0 : i64, scratch_operands = 0 : i64, tpu.core_type = #tpu.core_type<tc>, window_params = [{transform_indices = @transform_0, window_bounds = array<i64: 8, 32>}, {transform_indices = @transform_1, window_bounds = array<i64: 8, 32>}, {transform_indices = @transform_2, window_bounds = array<i64: 8, 16>}, {pipeline_mode = #tpu.pipeline_mode<synchronous>, transform_indices = @transform_3, window_bounds = array<i64: 32, 128>}, {pipeline_mode = #tpu.pipeline_mode<synchronous>, transform_indices = @transform_4, window_bounds = array<i64: 32, 128>}, {pipeline_mode = #tpu.pipeline_mode<synchronous>, transform_indices = @transform_5, window_bounds = array<i64: 16, 128>}, {pipeline_mode = #tpu.pipeline_mode<synchronous>, transform_indices = @transform_6, window_bounds = array<i64: 1, 128>}, {pipeline_mode = #tpu.pipeline_mode<synchronous>, transform_indices = @transform_7, window_bounds = array<i64: 128, 128>}, {pipeline_mode = #tpu.pipeline_mode<synchronous>, transform_indices = @transform_8, window_bounds = array<i64: 1, 128>}, {pipeline_mode = #tpu.pipeline_mode<synchronous>, transform_indices = @transform_9, window_bounds = array<i64: 128, 128>}, {pipeline_mode = #tpu.pipeline_mode<synchronous>, transform_indices = @transform_10, window_bounds = array<i64: 1, 128>}, {transform_indices = @transform_11, window_bounds = array<i64: 8, 128>}]} {
    %c0 = arith.constant 0 : index
    %c0_0 = arith.constant 0 : index
    %0 = vector.load %arg1[%c0, %c0_0] : memref<8x32xf32, #tpu.memory_space<vmem>>, vector<8x32xf32>
    %c0_1 = arith.constant 0 : index
    %c0_2 = arith.constant 0 : index
    %1 = vector.load %arg4[%c0_1, %c0_2] : memref<32x128xf32, #tpu.memory_space<vmem>>, vector<32x128xf32>
    %cst = arith.constant dense<0.000000e+00> : vector<8x128xf32>
    %2 = tpu.matmul %0, %1, %cst {dimension_numbers = #tpu.dot_dimension_numbers<[1], [0], [0], [1], [0, 0, 1, 1], [], []>} : vector<8x32xf32>, vector<32x128xf32>, vector<8x128xf32> -> vector<8x128xf32>
    %c0_3 = arith.constant 0 : index
    %c0_4 = arith.constant 0 : index
    %3 = vector.load %arg2[%c0_3, %c0_4] : memref<8x32xf32, #tpu.memory_space<vmem>>, vector<8x32xf32>
    %c0_5 = arith.constant 0 : index
    %c0_6 = arith.constant 0 : index
    %4 = vector.load %arg5[%c0_5, %c0_6] : memref<32x128xf32, #tpu.memory_space<vmem>>, vector<32x128xf32>
    %cst_7 = arith.constant dense<0.000000e+00> : vector<8x128xf32>
    %5 = tpu.matmul %3, %4, %cst_7 {dimension_numbers = #tpu.dot_dimension_numbers<[1], [0], [0], [1], [0, 0, 1, 1], [], []>} : vector<8x32xf32>, vector<32x128xf32>, vector<8x128xf32> -> vector<8x128xf32>
    %6 = arith.addf %2, %5 : vector<8x128xf32>
    %c0_8 = arith.constant 0 : index
    %c0_9 = arith.constant 0 : index
    %7 = vector.load %arg3[%c0_8, %c0_9] : memref<8x16xf32, #tpu.memory_space<vmem>>, vector<8x16xf32>
    %c0_10 = arith.constant 0 : index
    %c0_11 = arith.constant 0 : index
    %8 = vector.load %arg6[%c0_10, %c0_11] : memref<16x128xf32, #tpu.memory_space<vmem>>, vector<16x128xf32>
    %cst_12 = arith.constant dense<0.000000e+00> : vector<8x128xf32>
    %9 = tpu.matmul %7, %8, %cst_12 {dimension_numbers = #tpu.dot_dimension_numbers<[1], [0], [0], [1], [0, 0, 1, 1], [], []>} : vector<8x16xf32>, vector<16x128xf32>, vector<8x128xf32> -> vector<8x128xf32>
    %10 = arith.addf %6, %9 : vector<8x128xf32>
    %c0_13 = arith.constant 0 : index
    %c0_14 = arith.constant 0 : index
    %11 = vector.load %arg7[%c0_13, %c0_14] : memref<1x128xf32, #tpu.memory_space<vmem>>, vector<1x128xf32>
    %12 = vector.broadcast %11 : vector<1x128xf32> to vector<8x128xf32>
    %13 = arith.addf %10, %12 : vector<8x128xf32>
    %cst_15 = arith.constant 0.000000e+00 : f32
    %14 = vector.broadcast %cst_15 : f32 to vector<8x128xf32>
    %15 = arith.maximumf %13, %14 : vector<8x128xf32>
    %c0_16 = arith.constant 0 : index
    %c0_17 = arith.constant 0 : index
    %16 = vector.load %arg8[%c0_16, %c0_17] : memref<128x128xf32, #tpu.memory_space<vmem>>, vector<128x128xf32>
    %cst_18 = arith.constant dense<0.000000e+00> : vector<8x128xf32>
    %17 = tpu.matmul %15, %16, %cst_18 {dimension_numbers = #tpu.dot_dimension_numbers<[1], [0], [0], [1], [0, 0, 1, 1], [], []>} : vector<8x128xf32>, vector<128x128xf32>, vector<8x128xf32> -> vector<8x128xf32>
    %c0_19 = arith.constant 0 : index
    %c0_20 = arith.constant 0 : index
    %18 = vector.load %arg9[%c0_19, %c0_20] : memref<1x128xf32, #tpu.memory_space<vmem>>, vector<1x128xf32>
    %19 = vector.broadcast %18 : vector<1x128xf32> to vector<8x128xf32>
    %20 = arith.addf %17, %19 : vector<8x128xf32>
    %cst_21 = arith.constant 0.000000e+00 : f32
    %21 = vector.broadcast %cst_21 : f32 to vector<8x128xf32>
    %22 = arith.maximumf %20, %21 : vector<8x128xf32>
    %c0_22 = arith.constant 0 : index
    %c0_23 = arith.constant 0 : index
    %23 = vector.load %arg10[%c0_22, %c0_23] : memref<128x128xf32, #tpu.memory_space<vmem>>, vector<128x128xf32>
    %cst_24 = arith.constant dense<0.000000e+00> : vector<8x128xf32>
    %24 = tpu.matmul %22, %23, %cst_24 {dimension_numbers = #tpu.dot_dimension_numbers<[1], [0], [0], [1], [0, 0, 1, 1], [], []>} : vector<8x128xf32>, vector<128x128xf32>, vector<8x128xf32> -> vector<8x128xf32>
    %c0_25 = arith.constant 0 : index
    %c0_26 = arith.constant 0 : index
    %25 = vector.load %arg11[%c0_25, %c0_26] : memref<1x128xf32, #tpu.memory_space<vmem>>, vector<1x128xf32>
    %26 = vector.broadcast %25 : vector<1x128xf32> to vector<8x128xf32>
    %27 = arith.addf %24, %26 : vector<8x128xf32>
    %cst_27 = arith.constant 2.000000e+01 : f32
    %28 = vector.broadcast %cst_27 : f32 to vector<8x128xf32>
    %29 = arith.cmpf ogt, %27, %28 : vector<8x128xf32>
    %cst_28 = arith.constant 2.000000e+01 : f32
    %30 = vector.broadcast %cst_28 : f32 to vector<8x128xf32>
    %31 = arith.minimumf %27, %30 : vector<8x128xf32>
    %32 = math.exp %31 : vector<8x128xf32>
    %33 = math.log1p %32 : vector<8x128xf32>
    %34 = arith.select %29, %27, %33 : vector<8x128xi1>, vector<8x128xf32>
    %35 = tpu.iota {dimensions = array<i32: 1>} : vector<8x128xi32>
    %c32_i32 = arith.constant 32 : i32
    %36 = vector.broadcast %c32_i32 : i32 to vector<8x128xi32>
    %37 = arith.cmpi sge, %35, %36 : vector<8x128xi32>
    %38 = arith.select %37, %34, %27 : vector<8x128xi1>, vector<8x128xf32>
    %c0_29 = arith.constant 0 : index
    %c0_30 = arith.constant 0 : index
    %39 = vector.load %arg12[%c0_29, %c0_30] : memref<8x128xf32, #tpu.memory_space<vmem>>, vector<8x128xf32>
    tpu.vector_store %arg12[%c0_29, %c0_30], %38 {strides = array<i32>} : memref<8x128xf32, #tpu.memory_space<vmem>>, vector<8x128xf32>,
    return
  }
  func.func @transform_0(%arg0: i32) -> (i32, i32) {
    %c0_i32 = arith.constant 0 : i32
    %c0_i32_0 = arith.constant 0 : i32
    return %arg0, %c0_i32 : i32, i32
  }
  func.func @transform_1(%arg0: i32) -> (i32, i32) {
    %c0_i32 = arith.constant 0 : i32
    %c0_i32_0 = arith.constant 0 : i32
    return %arg0, %c0_i32 : i32, i32
  }
  func.func @transform_2(%arg0: i32) -> (i32, i32) {
    %c0_i32 = arith.constant 0 : i32
    %c0_i32_0 = arith.constant 0 : i32
    return %arg0, %c0_i32 : i32, i32
  }
  func.func @transform_3(%arg0: i32) -> (i32, i32) {
    %c0_i32 = arith.constant 0 : i32
    %c0_i32_0 = arith.constant 0 : i32
    %c0_i32_1 = arith.constant 0 : i32
    return %c0_i32, %c0_i32_0 : i32, i32
  }
  func.func @transform_4(%arg0: i32) -> (i32, i32) {
    %c0_i32 = arith.constant 0 : i32
    %c0_i32_0 = arith.constant 0 : i32
    %c0_i32_1 = arith.constant 0 : i32
    return %c0_i32, %c0_i32_0 : i32, i32
  }
  func.func @transform_5(%arg0: i32) -> (i32, i32) {
    %c0_i32 = arith.constant 0 : i32
    %c0_i32_0 = arith.constant 0 : i32
    %c0_i32_1 = arith.constant 0 : i32
    return %c0_i32, %c0_i32_0 : i32, i32
  }
  func.func @transform_6(%arg0: i32) -> (i32, i32) {
    %c0_i32 = arith.constant 0 : i32
    %c0_i32_0 = arith.constant 0 : i32
    %c0_i32_1 = arith.constant 0 : i32
    return %c0_i32, %c0_i32_0 : i32, i32
  }
  func.func @transform_7(%arg0: i32) -> (i32, i32) {
    %c0_i32 = arith.constant 0 : i32
    %c0_i32_0 = arith.constant 0 : i32
    %c0_i32_1 = arith.constant 0 : i32
    return %c0_i32, %c0_i32_0 : i32, i32
  }
  func.func @transform_8(%arg0: i32) -> (i32, i32) {
    %c0_i32 = arith.constant 0 : i32
    %c0_i32_0 = arith.constant 0 : i32
    %c0_i32_1 = arith.constant 0 : i32
    return %c0_i32, %c0_i32_0 : i32, i32
  }
  func.func @transform_9(%arg0: i32) -> (i32, i32) {
    %c0_i32 = arith.constant 0 : i32
    %c0_i32_0 = arith.constant 0 : i32
    %c0_i32_1 = arith.constant 0 : i32
    return %c0_i32, %c0_i32_0 : i32, i32
  }
  func.func @transform_10(%arg0: i32) -> (i32, i32) {
    %c0_i32 = arith.constant 0 : i32
    %c0_i32_0 = arith.constant 0 : i32
    %c0_i32_1 = arith.constant 0 : i32
    return %c0_i32, %c0_i32_0 : i32, i32
  }
  func.func @transform_11(%arg0: i32) -> (i32, i32) {
    %c0_i32 = arith.constant 0 : i32
    %c0_i32_0 = arith.constant 0 : i32
    return %arg0, %c0_i32 : i32, i32
  }
}

</mosaic_0001>

<bundles_post_ra>
// kernel: vrnn_emission_forward.1
= control target key start
LH: loop header
LB: loop body
LE: loop exit
PB: predicated region body
PF: predicated region fallthrough
CT: control target
= control target key end

     0   :  { %v714_v0 = vmov 0.0|0.0   ;;  %vm715_vm0 = vmmov 0   ;;  %v716_v8 = vmov 0.0   ;;  %vm48_vm1 = vcmask 261120   ;;  %s950_s4 = inlined_call_operand.vmem [shape: f32[32,128], index: 4, kind: input, shape index: {}]   ;;  %s951_s3 = inlined_call_operand.vmem [shape: f32[32,128], index: 3, kind: input, shape index: {}]   ;;  %s952_s5 = inlined_call_operand.vmem [shape: f32[16,128], index: 5, kind: input, shape index: {}]   ;;  %s953_s7 = inlined_call_operand.vmem [shape: f32[128,128], index: 7, kind: input, shape index: {}]   ;;  %s954_s1 = inlined_call_operand.vmem [shape: f32[8,32], index: 1, kind: input, shape index: {}]   ;;  %s955_s0 = inlined_call_operand.vmem [shape: f32[8,32], index: 0, kind: input, shape index: {}]   ;;  %s956_s2 = inlined_call_operand.vmem [shape: f32[8,16], index: 2, kind: input, shape index: {}]   ;;  %s957_s9 = inlined_call_operand.vmem [shape: f32[128,128], index: 9, kind: input, shape index: {}]   ;;  %s958_s6 = inlined_call_operand.vmem [shape: f32[1,128], index: 6, kind: input, shape index: {}]   ;;  %s959_s8 = inlined_call_operand.vmem [shape: f32[1,128], index: 8, kind: input, shape index: {}]   ;;  %s960_s10 = inlined_call_operand.vmem [shape: f32[1,128], index: 10, kind: input, shape index: {}]   ;;  %s961_s11 = inlined_call_operand.vmem [shape: f32[8,128], index: 11, kind: output, shape index: {}]  }
   0x1   :  { %644 = vmatprep.subr.bf16.mxu0 %v714_v0  ;;  %v44_v1 = vld [vmem:[%s950_s4] sm:$0xff]  ;;  %v45_v2 = vld [vmem:[%s950_s4 + $0x8] sm:$0xff]  ;;  %650 = vmatprep.subr.bf16.mxu1 %v714_v0  ;;  %v46_v6 = vld [vmem:[%s950_s4 + $0x10] sm:$0xff]  ;;  %vm198_vm2 = vcmask 130048  }
   0x2   :  { %v39_v3 = vld [vmem:[%s951_s3] sm:$0xff]  ;;  %v645_v4 = vpack.c.bf16 %v45_v2, %v44_v1  ;;  %v40_v5 = vld [vmem:[%s951_s3 + $0x8] sm:$0xff]  ;;  %v47_v7 = vld [vmem:[%s950_s4 + $0x18] sm:$0xff]  ;;  %553 = vmatprep.mubr.msk.f32.mxu0 %vm715_vm0, %v716_v8  ;;  %564 = vmatprep.mubr.msk.f32.mxu1 %vm715_vm0, %v716_v8 }
   0x3   :  { %v651_v9 = vpack.c.bf16 %v40_v5, %v39_v3  ;;  %v41_v10 = vld [vmem:[%s951_s3 + $0x10] sm:$0xff]  ;;  %v42_v11 = vld [vmem:[%s951_s3 + $0x18] sm:$0xff]  ;;  %v648_v12 = vpack.c.bf16 %v47_v7, %v46_v6  ;;  %v196_v14 = vld [vmem:[%s952_s5] sm:$0xff] }
   0x4   :  { %646 = vmatpush3.bf16.msra.mxu0 %v645_v4  ;;  %v654_v13 = vpack.c.bf16 %v42_v11, %v41_v10  ;;  %v197_v15 = vld [vmem:[%s952_s5 + $0x8] sm:$0xff]  ;;  %v282_v16 = vld [vmem:[%s953_s7] sm:$0xff]  ;;  %v284_v22 = vld [vmem:[%s953_s7 + $0x10] sm:$0xff] }
   0x5   :  { %652 = vmatpush3.bf16.msra.mxu1 %v651_v9  ;;  %647 = vmatprep.subr.bf16.mxu0 %v714_v0  ;;  %v283_v17 = vld [vmem:[%s953_s7 + $0x8] sm:$0xff]  ;;  %v43_v18 = vld [vmem:[%s954_s1] sm:$0xff]  ;;  %v657_v19 = vpack.c.bf16 %v197_v15, %v196_v14  ;;  %v285_v23 = vld [vmem:[%s953_s7 + $0x18] sm:$0xff] }
   0x6   :  { %653 = vmatprep.subr.bf16.mxu1 %v714_v0  ;;  %v38_v20 = vld [vmem:[%s955_s0] sm:$0xff]  ;;  %v660_v21 = vpack.c.bf16 %v283_v17, %v282_v16  ;;  %v663_v25 = vpack.c.bf16 %v285_v23, %v284_v22  ;;  %v287_v27 = vld [vmem:[%s953_s7 + $0x28] sm:$0xff]  ;;  %v288_v29 = vld [vmem:[%s953_s7 + $0x30] sm:$0xff] }
   0x7   :  { %v195_v24 = vld [vmem:[%s956_s2] sm:$0xff]  ;;  %v289_v30 = vld [vmem:[%s953_s7 + $0x38] sm:$0xff]  ;;  %v291_v33 = vld [vmem:[%s953_s7 + $0x48] sm:$0xff] }
   0x8   :  { %649 = vmatpush3.bf16.msra.mxu0 %v648_v12  ;;  %v286_v26 = vld [vmem:[%s953_s7 + $0x20] sm:$0xff]  ;;  %v669_v31 = vpack.c.bf16 %v289_v30, %v288_v29  ;;  %v292_v35 = vld [vmem:[%s953_s7 + $0x50] sm:$0xff]  ;;  %v293_v36 = vld [vmem:[%s953_s7 + $0x58] sm:$0xff]  ;;  %v483_v29 = vlaneseq }
   0x9   :  { %655 = vmatpush3.bf16.msra.mxu1 %v654_v13  ;;  %656 = vmatprep.subr.bf16.mxu0 %v714_v0  ;;  %v666_v28 = vpack.c.bf16 %v287_v27, %v286_v26  ;;  %v290_v32 = vld [vmem:[%s953_s7 + $0x40] sm:$0xff]  ;;  %v675_v37 = vpack.c.bf16 %v293_v36, %v292_v35  ;;  %v295_v39 = vld [vmem:[%s953_s7 + $0x68] sm:$0xff]  ;;  %v296_v41 = vld [vmem:[%s953_s7 + $0x70] sm:$0xff] }
   0xa   :  { %659 = vmatprep.subr.bf16.mxu1 %v714_v0  ;;  %v672_v34 = vpack.c.bf16 %v291_v33, %v290_v32  ;;  %v294_v38 = vld [vmem:[%s953_s7 + $0x60] sm:$0xff]  ;;  %v297_v42 = vld [vmem:[%s953_s7 + $0x78] sm:$0xff]  ;;  %v377_v45 = vld [vmem:[%s957_s9 + $0x8] sm:$0xff]  ;;  %v484_v32 = vand.u32 127, %v483_v29 }
   0xb   :  { %554 = vmatmul.mubr.msk.f32.vlgmr.msra.gmra.mrb[0].mxu0 %vm48_vm1, %v43_v18  ;;  %v678_v40 = vpack.c.bf16 %v295_v39, %v294_v38  ;;  %v681_v43 = vpack.c.bf16 %v297_v42, %v296_v41  ;;  %v376_v44 = vld [vmem:[%s957_s9] sm:$0xff]  ;;  %v378_v46 = vld [vmem:[%s957_s9 + $0x10] sm:$0xff]  ;;  %v379_v48 = vld [vmem:[%s957_s9 + $0x18] sm:$0xff] }
   0xc   :  { %565 = vmatmul.mubr.msk.f32.vlgmr.msra.gmra.mrb[0].mxu1 %vm48_vm1, %v38_v20  ;;  %658 = vmatpush3.bf16.msra.mxu0 %v657_v19  ;;  %v684_v47 = vpack.c.bf16 %v377_v45, %v376_v44  ;;  %v687_v49 = vpack.c.bf16 %v379_v48, %v378_v46  ;;  %v380_v50 = vld [vmem:[%s957_s9 + $0x20] sm:$0xff]  ;;  %v381_v51 = vld [vmem:[%s957_s9 + $0x28] sm:$0xff]  ;;  %v382_v53 = vld [vmem:[%s957_s9 + $0x30] sm:$0xff]  ;;  %vm485_vm4 = vcmp.ge.s32.totalorder %v484_v32, 32 }
   0xd   :  { %571 = vmatprep.mubr.msk.f32.mxu0 %vm715_vm0, %v716_v8  ;;  %661 = vmatpush3.bf16.msra.mxu1 %v660_v21  ;;  %v690_v52 = vpack.c.bf16 %v381_v51, %v380_v50  ;;  %v383_v54 = vld [vmem:[%s957_s9 + $0x38] sm:$0xff]  ;;  %v384_v56 = vld [vmem:[%s957_s9 + $0x40] sm:$0xff]  ;;  %v385_v57 = vld [vmem:[%s957_s9 + $0x48] sm:$0xff] }
   0xe   :  { %662 = vmatprep.subr.bf16.mxu1 %v714_v0  ;;  %606 = vmatprep.mubr.msk.f32.mxu1 %vm715_vm0, %v716_v8  ;;  %v693_v55 = vpack.c.bf16 %v383_v54, %v382_v53  ;;  %v696_v58 = vpack.c.bf16 %v385_v57, %v384_v56  ;;  %v386_v59 = vld [vmem:[%s957_s9 + $0x50] sm:$0xff]  ;;  %v387_v60 = vld [vmem:[%s957_s9 + $0x58] sm:$0xff]  ;;  %v388_v62 = vld [vmem:[%s957_s9 + $0x60] sm:$0xff] }
   0xf   :  { %572 = vmatmul.mubr.msk.f32.vlgmr.msra.gmra.mrb[2].mxu0 %vm198_vm2, %v195_v24  ;;  %683 = vmatprep.subr.bf16.mxu0 %v714_v0  ;;  %v699_v61 = vpack.c.bf16 %v387_v60, %v386_v59  ;;  %v389_v63 = vld [vmem:[%s957_s9 + $0x68] sm:$0xff]  ;;  %v390_v13 = vld [vmem:[%s957_s9 + $0x70] sm:$0xff]  ;;  %v496_v15 = vld [vmem:[%s959_s8] ss:$0 sm:$0xff] }
  0x10   :  { %641 = vmatprep.mubr.msk.f32.mxu0 %vm715_vm0, %v716_v8  ;;  %685 = vmatpush3.bf16.msra.mxu0 %v684_v47  ;;  %v702_v1 = vpack.c.bf16 %v389_v63, %v388_v62  ;;  %v495_v8 = vld [vmem:[%s958_s6] ss:$0 sm:$0xff] }
  0x11   :  { %664 = vmatpush3.bf16.msra.mxu1 %v663_v25  ;;  %686 = vmatprep.subr.bf16.mxu0 %v714_v0  ;;  %v497_v20 = vld [vmem:[%s960_s10] ss:$0 sm:$0xff] }
  0x12   :  { %665 = vmatprep.subr.bf16.mxu1 %v714_v0 }
  0x14   :  { %688 = vmatpush3.bf16.msra.mxu0 %v687_v49 }
  0x15   :  { %667 = vmatpush3.bf16.msra.mxu1 %v666_v28  ;;  %689 = vmatprep.subr.bf16.mxu0 %v714_v0 }
  0x16   :  { %668 = vmatprep.subr.bf16.mxu1 %v714_v0 }
  0x18   :  { %691 = vmatpush3.bf16.msra.mxu0 %v690_v52 }
  0x19   :  { %670 = vmatpush3.bf16.msra.mxu1 %v669_v31  ;;  %692 = vmatprep.subr.bf16.mxu0 %v714_v0 }
  0x1a   :  { %671 = vmatprep.subr.bf16.mxu1 %v714_v0 }
  0x1c   :  { %694 = vmatpush3.bf16.msra.mxu0 %v693_v55 }
  0x1d   :  { %673 = vmatpush3.bf16.msra.mxu1 %v672_v34  ;;  %695 = vmatprep.subr.bf16.mxu0 %v714_v0 }
  0x1e   :  { %674 = vmatprep.subr.bf16.mxu1 %v714_v0 }
  0x20   :  { %697 = vmatpush3.bf16.msra.mxu0 %v696_v58 }
  0x21   :  { %676 = vmatpush3.bf16.msra.mxu1 %v675_v37  ;;  %698 = vmatprep.subr.bf16.mxu0 %v714_v0 }
  0x22   :  { %677 = vmatprep.subr.bf16.mxu1 %v714_v0 }
  0x24   :  { %700 = vmatpush3.bf16.msra.mxu0 %v699_v61 }
  0x25   :  { %679 = vmatpush3.bf16.msra.mxu1 %v678_v40  ;;  %701 = vmatprep.subr.bf16.mxu0 %v714_v0 }
  0x26   :  { %680 = vmatprep.subr.bf16.mxu1 %v714_v0 }
  0x28   :  { %703 = vmatpush3.bf16.msra.mxu0 %v702_v1 }
  0x29   :  { %682 = vmatpush3.bf16.msra.mxu1 %v681_v43  ;;  %704 = vmatprep.subr.bf16.mxu0 %v714_v0  ;;  %v391_v0 = vld [vmem:[%s957_s9 + $0x78] sm:$0xff] }
  0x2a   :  { %v705_v14 = vpack.c.bf16 %v391_v0, %v390_v13 }
  0x2c   :  { %706 = vmatpush3.bf16.msra.mxu0 %v705_v14 }
  0xde   :  { %v118_v2 = vpop.f32.mrb[0].mxu0 }
  0xdf   :  { %v555_v3 = vpop.f32.mrb[1].mxu0  ;;  %v191_v4 = vpop.f32.mrb[0].mxu1 }
  0xe0   :  { %v192_v5 = vadd.f32 %v191_v4, %v118_v2  ;;  %v566_v6 = vpop.f32.mrb[1].mxu1 }
  0xe2   :  { %v268_v7 = vpop.f32.mrb[2].mxu0 }
  0xe3   :  { %v272_v9 = vadd.f32 %v268_v7, %v192_v5  ;;  %v573_v10 = vpop.f32.mrb[3].mxu0 }
  0xe5   :  { %v280_v11 = vadd.f32 %v495_v8, %v272_v9 }
  0xe7   :  { %v281_v12 = vmax.f32 %v280_v11, 0.0 }
  0xe9   :  { %607 = vmatmul.mubr.f32.vlgmr.msra.gmra.mrb[2].mxu1 %v281_v12 }
 0x1bc   :  { %v371_v16 = vpop.f32.mrb[2].mxu1 }
 0x1bd   :  { %v372_v17 = vadd.f32 %v496_v15, %v371_v16  ;;  %v608_v18 = vpop.f32.mrb[3].mxu1 }
 0x1bf   :  { %v375_v19 = vmax.f32 %v372_v17, 0.0 }
 0x1c1   :  { %642 = vmatmul.mubr.f32.vlgmr.msra.gmra.mrb[4].mxu0 %v375_v19 }
 0x294   :  { %v465_v21 = vpop.f32.mrb[4].mxu0 }
 0x295   :  { %v466_v22 = vadd.f32 %v497_v20, %v465_v21  ;;  %v643_v23 = vpop.f32.mrb[5].mxu0 }
 0x297   :  { %v470_v24 = vmin.f32 %v466_v22, 20.0  ;;  %vm469_vm5 = vcmp.gt.f32.partialorder %v466_v22, 20.0 }
 0x299   :  { %v471_v25 = vmul.f32 1.442695, %v470_v24 }
 0x29b   :  { %710 = vpow2.f32 %v471_v25 }
 0x2a5   :  { %v711_v26 = vpop.eup %710 }
 0x2a6   :  { %v473_v27 = vadd.f32 1.0, %v711_v26  ;;  %v476_v28 = vmul.f32 -0.5, %v711_v26  ;;  %v479_v31 = vand.u32 2147483647, %v711_v26 }
 0x2a8   :  { %712 = vlog2.f32 %v473_v27  ;;  %v477_v30 = vadd.f32 1.0, %v476_v28  ;;  %vm480_vm3 = vcmp.lt.f32.partialorder %v479_v31, 0.0004427343 }
 0x2aa   :  { %v478_v35 = vmul.f32 %v711_v26, %v477_v30 }
 0x2b2   :  { %v713_v33 = vpop.eup %712 }
 0x2b3   :  { %v475_v34 = vmul.f32 0.6931472, %v713_v33 }
 0x2b5   :  { %v481_v36 = vsel %vm480_vm3, %v478_v35, %v475_v34 }
 0x2b6   :  { %v482_v37 = vsel %vm469_vm5, %v466_v22, %v481_v36 }
 0x2b7   :  { %v486_v38 = vsel %vm485_vm4, %v482_v37, %v466_v22 }
 0x2b8   :  { %487 = vst [vmem:[%s961_s11] sm:$0xff] %v486_v38 }

</bundles_post_ra>
